<compile_context>
chip_gen: v5e
topology: v5e:2x2
jax: 0.10.0
libtpu: 0.0.40
codegen_flags: <defaults>
</compile_context>

<pallas_src>
import jax
import jax.numpy as jnp
from jax import lax
from jax.experimental import pallas as pl
from jax.experimental.pallas import tpu as pltpu

KH = 10        # conv kernel height
STRIDE_H = 2
PAD_H = 5
EPS = 1e-5     # BatchNorm eps


def freq_conv_block_kernel(lhsT_ref, wt_ref, b_ref, w1_ref, w2_ref, o_ref):
    # lhsT_ref: (NB, KH*Cin, Ho*W)  transposed im2col LHS (built in wrapper)
    # wt_ref  : (Cout, KH*Cin)      conv weight with eval-BN scale folded
    # b_ref   : (Cout, 1)           conv bias + eval-BN folded bias (column)
    # w1_ref  : (Chid, Cout)        SE fc1 weight (no bias)
    # w2_ref  : (Cout, Chid)        SE fc2 weight (no bias)
    # o_ref   : (NB, Cout, Ho*W)    NCHW-friendly output slab
    nb = lhsT_ref.shape[0]
    inv_hw = 1.0 / float(o_ref.shape[2])          # compile-time 1/(Ho*W)

    wt = wt_ref[...]
    b = b_ref[...]
    w1 = w1_ref[...]
    w2 = w2_ref[...]

    for i in range(nb):                            # static unroll, nb is tiny
        # conv (+ folded BN scale) as a single MXU matmul, already (Cout, Ho*W)
        y = jnp.dot(wt, lhsT_ref[i], preferred_element_type=jnp.float32)
        y = jnp.maximum(y + b, 0.0)                # folded bias + BN, ReLU
        # TODO(synk): Dropout(0.25) is identity in eval mode; not applied.

        # SE block: GAP -> fc1 -> ReLU -> fc2 -> sigmoid -> channel gate.
        s = jnp.sum(y, axis=-1, keepdims=True) * inv_hw            # (Cout, 1)
        h = jnp.maximum(jnp.dot(w1, s, preferred_element_type=jnp.float32), 0.0)
        g = jax.nn.sigmoid(jnp.dot(w2, h, preferred_element_type=jnp.float32))
        o_ref[i] = (y * g).astype(o_ref.dtype)


def _num_tensorcores():
    """Best-effort TensorCore count of the local chip (2 on v7x, else 1)."""
    try:
        kind = (getattr(jax.devices()[0], "device_kind", "") or "").lower()
        if "v7" in kind:
            return 2
    except Exception:
        pass
    return 1


def _padded_bytes(shape, itemsize=4):
    """Bytes of an f32 VMEM buffer after (8, 128) tile padding."""
    s = list(shape)
    s[-1] = -(-s[-1] // 128) * 128
    if len(s) >= 2:
        s[-2] = -(-s[-2] // 8) * 8
    n = 1
    for d in s:
        n *= d
    return n * itemsize


def freq_conv_block(x_nchw, params):
    """Pallas implementation. x_nchw: (N, Cin, H, W) f32 -> (N, Cout, Ho, W)."""
    wc_pt, bc, bn_gamma, bn_beta, bn_mean, bn_var, w1_pt, w2_pt = params
    n, cin, h, w = x_nchw.shape
    cout = wc_pt.shape[0]
    chid = w1_pt.shape[0]
    ho = (h + 2 * PAD_H - KH) // STRIDE_H + 1
    k = KH * cin
    m = ho * w

    # --- generation-aware batch grouping ---------------------------------
    # v5e/v6e have a single TensorCore: the grid is a serial loop, so use one
    # big step (nb = N).  Only on 2-TC v7x split the batch into 2 parallel
    # grid steps.
    groups = 2 if (_num_tensorcores() >= 2 and n >= 2 and n % 2 == 0) else 1
    nb = n // groups

    # --- wrapper-side im2col, transposed ----------------------------------
    # lhsT[n, kh*Cin + c, i*W + w] = x_padded[n, c, 2*i + kh, w]
    x_p = jnp.pad(x_nchw, ((0, 0), (0, 0), (PAD_H, PAD_H), (0, 0)))
    taps = [x_p[:, :, kh:kh + STRIDE_H * ho:STRIDE_H, :] for kh in range(KH)]
    lhs_t = jnp.stack(taps, axis=1).reshape(n, k, m)          # (N, K, Ho*W)

    # --- fold conv bias + eval-mode BatchNorm into one weight / bias ------
    bn_scale = bn_gamma / jnp.sqrt(bn_var + EPS)                     # (Cout,)
    wt = jnp.transpose(wc_pt[:, :, :, 0], (0, 2, 1)).reshape(cout, k)
    wt = wt * bn_scale[:, None]                                      # (Cout,K)
    b_fold = (bn_beta - bn_mean * bn_scale + bn_scale * bc).reshape(cout, 1)

    # --- VMEM budget from tile-padded bytes (v7x: 64 MiB/TC -> cap 48 MiB) -
    blk = _padded_bytes((nb, k, m)) + _padded_bytes((nb, cout, m))
    wgt = (_padded_bytes((cout, k)) + _padded_bytes((cout, 1))
           + _padded_bytes((chid, cout)) + _padded_bytes((cout, chid)))
    vmem_limit = int(min(max(4 * blk + 2 * wgt + (8 << 20), 16 << 20), 48 << 20))

    # TODO(synk): on v7x verify ("parallel",) really shards the 2-step grid
    # across both TensorCores (xprof); otherwise switch to pltpu.CORE_PARALLEL
    # or pl.core_map over pltpu.create_tensorcore_mesh.
    out_slab = pl.pallas_call(
        freq_conv_block_kernel,
        out_shape=jax.ShapeDtypeStruct((n, cout, m), x_nchw.dtype),
        grid=(groups,),
        in_specs=[
            pl.BlockSpec((nb, k, m), lambda g: (g, 0, 0)),
            pl.BlockSpec((cout, k), lambda g: (0, 0)),
            pl.BlockSpec((cout, 1), lambda g: (0, 0)),
            pl.BlockSpec((chid, cout), lambda g: (0, 0)),
            pl.BlockSpec((cout, chid), lambda g: (0, 0)),
        ],
        out_specs=pl.BlockSpec((nb, cout, m), lambda g: (g, 0, 0)),
        compiler_params=pltpu.CompilerParams(
            dimension_semantics=(("parallel",) if groups > 1 else ("arbitrary",)),
            vmem_limit_bytes=vmem_limit),
    )(lhs_t, wt, b_fold, w1_pt, w2_pt)

    # Output is already channel-major: only a free reshape back to NCHW.
    return out_slab.reshape(n, cout, ho, w)


def reference(x_nchw, params):
    """Plain-JAX reference matching PyTorch eval-mode semantics."""
    wc_pt, bc, g, b, mn, v, w1_pt, w2_pt = params
    x = jnp.transpose(x_nchw, (0, 2, 3, 1))                         # NHWC
    w_hwio = jnp.transpose(wc_pt, (2, 3, 1, 0))                     # (KH,1,Cin,Cout)
    y = lax.conv_general_dilated(
        x, w_hwio, (STRIDE_H, 1), [(PAD_H, PAD_H), (0, 0)],
        dimension_numbers=("NHWC", "HWIO", "NHWC"))
    y = y + bc
    scale = g / jnp.sqrt(v + EPS)
    y = y * scale + (b - mn * scale)
    y = jnp.maximum(y, 0.0)
    s = jnp.mean(y, axis=(1, 2))                                    # (N, Cout)
    hdd = jnp.maximum(s @ w1_pt.T, 0.0)
    gate = jax.nn.sigmoid(hdd @ w2_pt.T)
    y = y * gate[:, None, None, :]
    return jnp.transpose(y, (0, 3, 1, 2))


if __name__ == "__main__":
    N, CIN, H, W = 2, 4, 16, 16
    COUT = 32
    REDUCTION = 16
    CHID = COUT // REDUCTION

    key = jax.random.PRNGKey(0)
    kx, k0, k1, k2, k3, k4, k5, k6, k7 = jax.random.split(key, 9)

    x = jax.random.normal(kx, (N, CIN, H, W), jnp.float32)

    # Deterministic synthetic parameters in PyTorch layouts.
    wc_pt = 0.1 * jax.random.normal(k0, (COUT, CIN, KH, 1), jnp.float32)  # conv1.weight
    bc = 0.1 * jax.random.normal(k1, (COUT,), jnp.float32)                # conv1.bias
    bn_gamma = 1.0 + 0.1 * jax.random.normal(k2, (COUT,), jnp.float32)
    bn_beta = 0.1 * jax.random.normal(k3, (COUT,), jnp.float32)
    bn_mean = 0.1 * jax.random.normal(k4, (COUT,), jnp.float32)
    bn_var = 0.5 + jax.random.uniform(k5, (COUT,), jnp.float32)
    w1_pt = 0.3 * jax.random.normal(k6, (CHID, COUT), jnp.float32)        # se.fc[0].weight
    w2_pt = 0.3 * jax.random.normal(k7, (COUT, CHID), jnp.float32)        # se.fc[2].weight

    params = (wc_pt, bc, bn_gamma, bn_beta, bn_mean, bn_var, w1_pt, w2_pt)

    out = jax.block_until_ready(freq_conv_block(x, params))
    ref = jax.block_until_ready(reference(x, params))

    HO = (H + 2 * PAD_H - KH) // STRIDE_H + 1
    assert out.shape == (N, COUT, HO, W), out.shape
    assert jnp.allclose(out, ref, atol=1e-4, rtol=1e-4), (
        float(jnp.max(jnp.abs(out - ref))))
    print("KERNEL_OK")
</pallas_src>

<mosaic_0001>
module attributes {stable_mosaic.version = 11 : i64} {
  func.func @freq_conv_block_kernel(%arg0: i32, %arg1: memref<2x40x144xf32, #tpu.memory_space<vmem>>, %arg2: memref<32x40xf32, #tpu.memory_space<vmem>>, %arg3: memref<32x1xf32, #tpu.memory_space<vmem>>, %arg4: memref<2x32xf32, #tpu.memory_space<vmem>>, %arg5: memref<32x2xf32, #tpu.memory_space<vmem>>, %arg6: memref<2x32x144xf32, #tpu.memory_space<vmem>>) attributes {dimension_semantics = [#tpu.dimension_semantics<arbitrary>], iteration_bounds = array<i64: 1>, scalar_prefetch = 0 : i64, scratch_operands = 0 : i64, tpu.core_type = #tpu.core_type<tc>, window_params = [{transform_indices = @transform_0, window_bounds = array<i64: 2, 40, 144>}, {pipeline_mode = #tpu.pipeline_mode<synchronous>, transform_indices = @transform_1, window_bounds = array<i64: 32, 40>}, {pipeline_mode = #tpu.pipeline_mode<synchronous>, transform_indices = @transform_2, window_bounds = array<i64: 32, 1>}, {pipeline_mode = #tpu.pipeline_mode<synchronous>, transform_indices = @transform_3, window_bounds = array<i64: 2, 32>}, {pipeline_mode = #tpu.pipeline_mode<synchronous>, transform_indices = @transform_4, window_bounds = array<i64: 32, 2>}, {transform_indices = @transform_5, window_bounds = array<i64: 2, 32, 144>}]} {
    %c0 = arith.constant 0 : index
    %c0_0 = arith.constant 0 : index
    %0 = vector.load %arg2[%c0, %c0_0] : memref<32x40xf32, #tpu.memory_space<vmem>>, vector<32x40xf32>
    %c0_1 = arith.constant 0 : index
    %c0_2 = arith.constant 0 : index
    %1 = vector.load %arg3[%c0_1, %c0_2] : memref<32x1xf32, #tpu.memory_space<vmem>>, vector<32x1xf32>
    %c0_3 = arith.constant 0 : index
    %c0_4 = arith.constant 0 : index
    %2 = vector.load %arg4[%c0_3, %c0_4] : memref<2x32xf32, #tpu.memory_space<vmem>>, vector<2x32xf32>
    %c0_5 = arith.constant 0 : index
    %c0_6 = arith.constant 0 : index
    %3 = vector.load %arg5[%c0_5, %c0_6] : memref<32x2xf32, #tpu.memory_space<vmem>>, vector<32x2xf32>
    %c0_7 = arith.constant 0 : index
    %c0_8 = arith.constant 0 : index
    %c0_9 = arith.constant 0 : index
    %4 = vector.load %arg1[%c0_7, %c0_8, %c0_9] : memref<2x40x144xf32, #tpu.memory_space<vmem>>, vector<1x40x144xf32>
    %5 = vector.shape_cast %4 : vector<1x40x144xf32> to vector<40x144xf32>
    %cst = arith.constant dense<0.000000e+00> : vector<32x144xf32>
    %6 = tpu.matmul %0, %5, %cst {dimension_numbers = #tpu.dot_dimension_numbers<[1], [0], [0], [1], [0, 0, 1, 1], [], []>} : vector<32x40xf32>, vector<40x144xf32>, vector<32x144xf32> -> vector<32x144xf32>
    %7 = vector.broadcast %1 : vector<32x1xf32> to vector<32x144xf32>
    %8 = arith.addf %6, %7 : vector<32x144xf32>
    %cst_10 = arith.constant 0.000000e+00 : f32
    %9 = vector.broadcast %cst_10 : f32 to vector<32x144xf32>
    %10 = arith.maximumf %8, %9 : vector<32x144xf32>
    %cst_11 = arith.constant dense<0.000000e+00> : vector<32xf32>
    %11 = vector.multi_reduction <add>, %10, %cst_11 [1] : vector<32x144xf32> to vector<32xf32>
    %12 = vector.shape_cast %11 : vector<32xf32> to vector<32x1xf32>
    %cst_12 = arith.constant 0.0069444445 : f32
    %13 = vector.broadcast %cst_12 : f32 to vector<32x1xf32>
    %14 = arith.mulf %12, %13 : vector<32x1xf32>
    %cst_13 = arith.constant dense<0.000000e+00> : vector<2x1xf32>
    %15 = tpu.matmul %2, %14, %cst_13 {dimension_numbers = #tpu.dot_dimension_numbers<[1], [0], [0], [1], [0, 0, 1, 1], [], []>} : vector<2x32xf32>, vector<32x1xf32>, vector<2x1xf32> -> vector<2x1xf32>
    %cst_14 = arith.constant 0.000000e+00 : f32
    %16 = vector.broadcast %cst_14 : f32 to vector<2x1xf32>
    %17 = arith.maximumf %15, %16 : vector<2x1xf32>
    %cst_15 = arith.constant dense<0.000000e+00> : vector<32x1xf32>
    %18 = tpu.matmul %3, %17, %cst_15 {dimension_numbers = #tpu.dot_dimension_numbers<[1], [0], [0], [1], [0, 0, 1, 1], [], []>} : vector<32x2xf32>, vector<2x1xf32>, vector<32x1xf32> -> vector<32x1xf32>
    %19 = arith.negf %18 : vector<32x1xf32>
    %20 = math.exp %19 : vector<32x1xf32>
    %cst_16 = arith.constant 1.000000e+00 : f32
    %21 = vector.broadcast %cst_16 : f32 to vector<32x1xf32>
    %22 = arith.addf %21, %20 : vector<32x1xf32>
    %23 = arith.divf %21, %22 : vector<32x1xf32>
    %24 = vector.broadcast %23 : vector<32x1xf32> to vector<32x144xf32>
    %25 = arith.mulf %10, %24 : vector<32x144xf32>
    %c0_17 = arith.constant 0 : index
    %c0_18 = arith.constant 0 : index
    %c0_19 = arith.constant 0 : index
    %26 = vector.load %arg6[%c0_17, %c0_18, %c0_19] : memref<2x32x144xf32, #tpu.memory_space<vmem>>, vector<1x32x144xf32>
    %27 = vector.shape_cast %26 : vector<1x32x144xf32> to vector<32x144xf32>
    %28 = vector.shape_cast %25 : vector<32x144xf32> to vector<1x32x144xf32>
    tpu.vector_store %arg6[%c0_17, %c0_18, %c0_19], %28 {strides = array<i32>} : memref<2x32x144xf32, #tpu.memory_space<vmem>>, vector<1x32x144xf32>,
    %c1 = arith.constant 1 : index
    %c0_20 = arith.constant 0 : index
    %c0_21 = arith.constant 0 : index
    %29 = vector.load %arg1[%c1, %c0_20, %c0_21] : memref<2x40x144xf32, #tpu.memory_space<vmem>>, vector<1x40x144xf32>
    %30 = vector.shape_cast %29 : vector<1x40x144xf32> to vector<40x144xf32>
    %cst_22 = arith.constant dense<0.000000e+00> : vector<32x144xf32>
    %31 = tpu.matmul %0, %30, %cst_22 {dimension_numbers = #tpu.dot_dimension_numbers<[1], [0], [0], [1], [0, 0, 1, 1], [], []>} : vector<32x40xf32>, vector<40x144xf32>, vector<32x144xf32> -> vector<32x144xf32>
    %32 = vector.broadcast %1 : vector<32x1xf32> to vector<32x144xf32>
    %33 = arith.addf %31, %32 : vector<32x144xf32>
    %cst_23 = arith.constant 0.000000e+00 : f32
    %34 = vector.broadcast %cst_23 : f32 to vector<32x144xf32>
    %35 = arith.maximumf %33, %34 : vector<32x144xf32>
    %cst_24 = arith.constant dense<0.000000e+00> : vector<32xf32>
    %36 = vector.multi_reduction <add>, %35, %cst_24 [1] : vector<32x144xf32> to vector<32xf32>
    %37 = vector.shape_cast %36 : vector<32xf32> to vector<32x1xf32>
    %cst_25 = arith.constant 0.0069444445 : f32
    %38 = vector.broadcast %cst_25 : f32 to vector<32x1xf32>
    %39 = arith.mulf %37, %38 : vector<32x1xf32>
    %cst_26 = arith.constant dense<0.000000e+00> : vector<2x1xf32>
    %40 = tpu.matmul %2, %39, %cst_26 {dimension_numbers = #tpu.dot_dimension_numbers<[1], [0], [0], [1], [0, 0, 1, 1], [], []>} : vector<2x32xf32>, vector<32x1xf32>, vector<2x1xf32> -> vector<2x1xf32>
    %cst_27 = arith.constant 0.000000e+00 : f32
    %41 = vector.broadcast %cst_27 : f32 to vector<2x1xf32>
    %42 = arith.maximumf %40, %41 : vector<2x1xf32>
    %cst_28 = arith.constant dense<0.000000e+00> : vector<32x1xf32>
    %43 = tpu.matmul %3, %42, %cst_28 {dimension_numbers = #tpu.dot_dimension_numbers<[1], [0], [0], [1], [0, 0, 1, 1], [], []>} : vector<32x2xf32>, vector<2x1xf32>, vector<32x1xf32> -> vector<32x1xf32>
    %44 = arith.negf %43 : vector<32x1xf32>
    %45 = math.exp %44 : vector<32x1xf32>
    %cst_29 = arith.constant 1.000000e+00 : f32
    %46 = vector.broadcast %cst_29 : f32 to vector<32x1xf32>
    %47 = arith.addf %46, %45 : vector<32x1xf32>
    %48 = arith.divf %46, %47 : vector<32x1xf32>
    %49 = vector.broadcast %48 : vector<32x1xf32> to vector<32x144xf32>
    %50 = arith.mulf %35, %49 : vector<32x144xf32>
    %c1_30 = arith.constant 1 : index
    %c0_31 = arith.constant 0 : index
    %c0_32 = arith.constant 0 : index
    %51 = vector.load %arg6[%c1_30, %c0_31, %c0_32] : memref<2x32x144xf32, #tpu.memory_space<vmem>>, vector<1x32x144xf32>
    %52 = vector.shape_cast %51 : vector<1x32x144xf32> to vector<32x144xf32>
    %53 = vector.shape_cast %50 : vector<32x144xf32> to vector<1x32x144xf32>
    tpu.vector_store %arg6[%c1_30, %c0_31, %c0_32], %53 {strides = array<i32>} : memref<2x32x144xf32, #tpu.memory_space<vmem>>, vector<1x32x144xf32>,
    return
  }
  func.func @transform_0(%arg0: i32) -> (i32, i32, i32) {
    %c0_i32 = arith.constant 0 : i32
    %c0_i32_0 = arith.constant 0 : i32
    %c0_i32_1 = arith.constant 0 : i32
    return %arg0, %c0_i32, %c0_i32_0 : i32, i32, i32
  }
  func.func @transform_1(%arg0: i32) -> (i32, i32) {
    %c0_i32 = arith.constant 0 : i32
    %c0_i32_0 = arith.constant 0 : i32
    %c0_i32_1 = arith.constant 0 : i32
    return %c0_i32, %c0_i32_0 : i32, i32
  }
  func.func @transform_2(%arg0: i32) -> (i32, i32) {
    %c0_i32 = arith.constant 0 : i32
    %c0_i32_0 = arith.constant 0 : i32
    %c0_i32_1 = arith.constant 0 : i32
    return %c0_i32, %c0_i32_0 : i32, i32
  }
  func.func @transform_3(%arg0: i32) -> (i32, i32) {
    %c0_i32 = arith.constant 0 : i32
    %c0_i32_0 = arith.constant 0 : i32
    %c0_i32_1 = arith.constant 0 : i32
    return %c0_i32, %c0_i32_0 : i32, i32
  }
  func.func @transform_4(%arg0: i32) -> (i32, i32) {
    %c0_i32 = arith.constant 0 : i32
    %c0_i32_0 = arith.constant 0 : i32
    %c0_i32_1 = arith.constant 0 : i32
    return %c0_i32, %c0_i32_0 : i32, i32
  }
  func.func @transform_5(%arg0: i32) -> (i32, i32, i32) {
    %c0_i32 = arith.constant 0 : i32
    %c0_i32_0 = arith.constant 0 : i32
    %c0_i32_1 = arith.constant 0 : i32
    return %arg0, %c0_i32, %c0_i32_0 : i32, i32, i32
  }
}

</mosaic_0001>

<bundles_post_ra>
// kernel: tpu_custom_call.1
= control target key start
LH: loop header
LB: loop body
LE: loop exit
PB: predicated region body
PF: predicated region fallthrough
CT: control target
= control target key end

     0   :  { %10 = vsyncpa [#allocation3], 0  ;;  %s1091_s0 = inlined_call_operand.hbm [shape: f32[2,40,144], index: 0, kind: input, shape index: {}]   ;;  %s1092_s1 = inlined_call_operand.vmem [shape: f32[32,40], index: 1, kind: input, shape index: {}]   ;;  %s1093_s2 = inlined_call_operand.vmem [shape: f32[32,1], index: 2, kind: input, shape index: {}]   ;;  %s1094_s3 = inlined_call_operand.vmem [shape: f32[2,32], index: 3, kind: input, shape index: {}]   ;;  %s1095_s4 = inlined_call_operand.vmem [shape: f32[32,2], index: 4, kind: input, shape index: {}]   ;;  %s1096_s5 = inlined_call_operand.hbm [shape: f32[2,32,144], index: 5, kind: output, shape index: {}]  }
   0x1   :  { %11 = vsyncpa [#allocation4], 0  ;;  %s16_s20 = sshll.u32 %s1091_s0, 4  ;;  %s778_s21 = smov [#allocation2]   ;;  %s17_s20 = int_to_ptr.hbm [resolvable:$true] %s16_s20 }
   0x2   :  { %s18_s22 = sshll.u32 %s778_s21, 4  ;;  %s779_s23 = smov 256   ;;  %s19_s22 = int_to_ptr.vmem [resolvable:$true] %s18_s22 }
   0x3   :  { %s780_s24 = smov 16  }
   0x4   :  { %24 = dma.hbm_to_vmem [thread:$0]  %s17_s20, 2560, %s19_s22, [#allocation3], %s779_s23, %s779_s23, %s780_s24  }
   0x5   :  { %774 = dma.done.wait [#allocation3], 2560  }
   0x6   :  { %775 = vsyncadd [#allocation3], 4294964736  ;;  %v781_v0 = vmov 0   ;;  %v58_v1 = vld [vmem:[#allocation2 + $0x40] sm:$0xff]  ;;  %v56_v2 = vld [vmem:[#allocation2 + $0x30] sm:$0xff]  ;;  %vm80_vm0 = vcmask 326656  }
   0x7   :  { %692 = vset.pattern.permute.xlu1 %v781_v0  ;;  %691 = vset.pattern.permute.xlu0 %v781_v0  ;;  %v59_v3 = vld [vmem:[#allocation2 + $0x48] sm:$0xff]  ;;  %v54_v4 = vld [vmem:[#allocation2 + $0x20] sm:$0xff]  ;;  %v57_v5 = vld [vmem:[#allocation2 + $0x38] sm:$0xff]  ;;  %vm159_vm1 = vcmask 130048   ;;  %vm180_vm2 = vcmask 261120   ;;  %vm218_vm3 = vcmask 1041408  }
   0x8   :  { %693 = vset.pattern.permute.xlu2 %v781_v0  ;;  %104 = vmatpush.msra.mxu0 %v58_v1  ;;  %v55_v6 = vld [vmem:[#allocation2 + $0x28] sm:$0xff]  ;;  %v52_v8 = vld [vmem:[#allocation2 + $0x10] sm:$0xff]  ;;  %v53_v9 = vld [vmem:[#allocation2 + $0x18] sm:$0xff]  ;;  %vm205_vm4 = vcmask 15360   ;;  %s632_s26 = sshll.u32 %s1096_s5, 4  ;;  %s633_s26 = int_to_ptr.hbm [resolvable:$true] %s632_s26 }
   0x9   :  { %681 = vmatpush.msra.mxu1 %v59_v3  ;;  %v42_v7 = vld [vmem:[%s1093_s2 + $0x8] sm:$0xff]  ;;  %v44_v10 = vld [vmem:[%s1093_s2 + $0x18] sm:$0xff]  ;;  %v50_v11 = vld [vmem:[#allocation2] sm:$0xff] }
   0xa   :  { %105 = vmatpush.msra.mxu0 %v56_v2  ;;  %67 = vperm.xlu1 %692, %v42_v7   ;;  %v828_v12 = vld [vmem:[%s1092_s1] sm:$0xff]  ;;  %v51_v13 = vld [vmem:[#allocation2 + $0x8] sm:$0xff]  ;;  %v43_v16 = vld [vmem:[%s1093_s2 + $0x10] sm:$0xff] }
   0xb   :  { %682 = vmatpush.msra.mxu1 %v57_v5  ;;  %77 = vperm.xlu0 %691, %v44_v10   ;;  %v833_v14 = vld [vmem:[%s1092_s1 + $0x8] sm:$0xff]  ;;  %v41_v15 = vld [vmem:[%s1093_s2] sm:$0xff]  ;;  %v848_v17 = vld [vmem:[%s1092_s1 + $0x10] sm:$0xff] }
   0xc   :  { %106 = vmatpush.msra.mxu0 %v54_v4  ;;  %v857_v18 = vld [vmem:[%s1092_s1 + $0x18] sm:$0xff]  ;;  %v930_v63 = vld [vmem:[%s1094_s3] sm:$0x3]  ;;  %v372_v0 = vld [vmem:[#allocation2 + $0x90] sm:$0xff] }
   0xd   :  { %683 = vmatpush.msra.mxu1 %v55_v6  ;;  %v370_v1 = vld [vmem:[#allocation2 + $0x80] sm:$0xff]  ;;  %v368_v2 = vld [vmem:[#allocation2 + $0x70] sm:$0xff]  ;;  %v369_v10 = vld [vmem:[#allocation2 + $0x78] sm:$0xff] }
   0xe   :  { %107 = vmatpush.msra.mxu0 %v52_v8  ;;  %v364_v4 = vld [vmem:[#allocation2 + $0x50] sm:$0xff]  ;;  %v945_v7 = vld [vmem:[%s1095_s4] sm:$0xff]  ;;  %v373_v8 = vld [vmem:[#allocation2 + $0x98] sm:$0xff] }
   0xf   :  { %684 = vmatpush.msra.mxu1 %v53_v9 }
  0x10   :  { %108 = vmatpush.msra.mxu0 %v50_v11  ;;  %v367_v11 = vld [vmem:[#allocation2 + $0x68] sm:$0xff] }
  0x11   :  { %645 = vmatmul.msk.f32.vlgmr.msra.gmra.mxu0 %vm80_vm0, %v828_v12  ;;  %685 = vmatpush.msra.mxu1 %v51_v13 }
  0x12   :  { %650 = vmatmul.msk.f32.vlgmr.msra.gmra.mxu1 %vm80_vm0, %v833_v14  ;;  %133 = vmatpush.msrb.mxu0 %v59_v3  ;;  %v366_v3 = vld [vmem:[#allocation2 + $0x60] sm:$0xff] }
  0x13   :  { %62 = vperm.xlu1 %692, %v41_v15   ;;  %72 = vperm.xlu0 %691, %v43_v16   ;;  %v365_v15 = vld [vmem:[#allocation2 + $0x58] sm:$0xff]  ;;  %v960_v16 = vld [vmem:[%s1095_s4 + $0x10] sm:$0xff] }
  0x14   :  { %134 = vmatpush.msrb.mxu0 %v57_v5 }
  0x16   :  { %135 = vmatpush.msrb.mxu0 %v55_v6 }
  0x18   :  { %136 = vmatpush.msrb.mxu0 %v53_v9  ;;  %v371_v9 = vld [vmem:[#allocation2 + $0x88] sm:$0xff] }
  0x19   :  { %646 = vmatmul.msk.f32.gmra.mxu0 %vm80_vm0, %v833_v14 }
  0x1a   :  { %651 = vmatmul.msk.f32.gmra.mxu1 %vm80_vm0, %v848_v17  ;;  %137 = vmatpush.msrb.mxu0 %v51_v13  ;;  %v953_v13 = vld [vmem:[%s1095_s4 + $0x8] sm:$0xff] }
  0x21   :  { %647 = vmatmul.msk.f32.gmra.mxu0 %vm80_vm0, %v848_v17 }
  0x22   :  { %652 = vmatmul.msk.f32.gmra.mxu1 %vm80_vm0, %v857_v18 }
  0x29   :  { %648 = vmatmul.msk.f32.gmra.mxu0 %vm80_vm0, %v857_v18 }
  0x31   :  { %649 = vmatmul.msk.f32.vlgmr.msrb.gmra.mxu0 %vm80_vm0, %v828_v12 }
  0x7c   :  { %v867_v20 = vpop.permute.xlu1 %67 }
  0x7d   :  { %v880_v29 = vpop.permute.xlu0 %77 }
  0x85   :  { %v888_v35 = vpop.permute.xlu0 %72  ;;  %v900_v41 = vpop.permute.xlu1 %62 }
  0x8e   :  { %v110_v19 = vpop.f32.mrf.mxu0 }
  0x8f   :  { %v142_v21 = vpop.f32.mrf.mxu1  ;;  %v909_v45 = vadd.f32 %v110_v19, %v900_v41  ;;  %v967_v19 = vld [vmem:[%s1095_s4 + $0x18] sm:$0xff]  ;;  %s782_s4 = smov [#allocation5]  }
  0x90   :  { %v870_v22 = vadd.f32 %v142_v21, %v867_v20  ;;  %s630_s22 = sshll.u32 %s782_s4, 4  ;;  %s631_s22 = int_to_ptr.vmem [resolvable:$true] %s630_s22 }
  0x91   :  { %v151_v51 = vmax.f32 %v909_v45, 0.0 }
  0x92   :  { %v154_v23 = vmax.f32 %v870_v22, 0.0 }
  0x94   :  { %v164_v27 = vsel %vm159_vm1, %v154_v23, 0.0 }
  0x96   :  { %v113_v24 = vpop.f32.mrf.mxu0 }
  0x97   :  { %v874_v25 = vadd.f32 %v113_v24, %v867_v20  ;;  %v145_v26 = vpop.f32.mrf.mxu1 }
  0x98   :  { %v894_v38 = vadd.f32 %v145_v26, %v888_v35 }
  0x99   :  { %v153_v28 = vmax.f32 %v874_v25, 0.0 }
  0x9a   :  { %v156_v44 = vmax.f32 %v894_v38, 0.0 }
  0x9b   :  { %v165_v30 = vadd.f32 %v164_v27, %v153_v28 }
  0x9c   :  { %v168_v49 = vsel %vm159_vm1, %v156_v44, 0.0 }
  0x9d   :  { %166 = vadd.xlane.f32.xlu0 %v165_v30 }
  0x9e   :  { %v116_v31 = vpop.f32.mrf.mxu0 }
  0x9f   :  { %v148_v32 = vpop.f32.mrf.mxu1  ;;  %v903_v42 = vadd.f32 %v116_v31, %v888_v35 }
  0xa0   :  { %v885_v33 = vadd.f32 %v148_v32, %v880_v29 }
  0xa1   :  { %v155_v47 = vmax.f32 %v903_v42, 0.0 }
  0xa2   :  { %v158_v34 = vmax.f32 %v885_v33, 0.0 }
  0xa3   :  { %v169_v52 = vadd.f32 %v168_v49, %v155_v47 }
  0xa4   :  { %v172_v39 = vsel %vm159_vm1, %v158_v34, 0.0 }
  0xa6   :  { %v119_v36 = vpop.f32.mrf.mxu0 }
  0xa7   :  { %v891_v37 = vadd.f32 %v119_v36, %v880_v29 }
  0xa9   :  { %v157_v40 = vmax.f32 %v891_v37, 0.0 }
  0xab   :  { %v173_v43 = vadd.f32 %v172_v39, %v157_v40 }
  0xad   :  { %174 = vadd.xlane.f32.xlu2 %v173_v43 }
  0xae   :  { %v139_v46 = vpop.f32.mrf.mxu0 }
  0xaf   :  { %v913_v48 = vadd.f32 %v139_v46, %v900_v41 }
  0xb1   :  { %v152_v50 = vmax.f32 %v913_v48, 0.0 }
  0xb3   :  { %v160_v53 = vsel %vm159_vm1, %v152_v50, 0.0 }
  0xb4   :  { %v161_v54 = vadd.f32 %v160_v53, %v151_v51 }
  0xb5   :  { %170 = vadd.xlane.f32.xlu2 %v169_v52 }
  0xb6   :  { %162 = vadd.xlane.f32.xlu1 %v161_v54 }
 0x110   :  { %v167_v57 = vpop.xlane.xlu0 %166 }
 0x111   :  { %v177_v61 = vmul.f32 0.0069444445, %v167_v57 }
 0x120   :  { %v175_v55 = vpop.xlane.xlu2 %174 }
 0x121   :  { %v179_v56 = vmul.f32 0.0069444445, %v175_v55 }
 0x123   :  { %196 = vmatpush.msra.mxu2 %v179_v56 }
 0x128   :  { %v171_v58 = vpop.xlane.xlu2 %170 }
 0x129   :  { %v178_v59 = vmul.f32 0.0069444445, %v171_v58  ;;  %v163_v60 = vpop.xlane.xlu1 %162 }
 0x12a   :  { %v176_v62 = vmul.f32 0.0069444445, %v163_v60 }
 0x12b   :  { %197 = vmatpush.msra.mxu2 %v178_v59 }
 0x12d   :  { %198 = vmatpush.msra.mxu2 %v177_v61 }
 0x12f   :  { %199 = vmatpush.msra.mxu2 %v176_v62 }
 0x130   :  { %653 = vmatmul.msk.f32.vlgmr.msra.gmra.mxu2 %vm180_vm2, %v930_v63 }
 0x131   :  { %385 = vmatpush.msrb.mxu2 %v372_v0 }
 0x133   :  { %386 = vmatpush.msrb.mxu2 %v370_v1 }
 0x135   :  { %387 = vmatpush.msrb.mxu2 %v368_v2 }
 0x137   :  { %388 = vmatpush.msrb.mxu2 %v366_v3 }
 0x139   :  { %389 = vmatpush.msrb.mxu2 %v364_v4 }
 0x13a   :  { %663 = vmatmul.msk.f32.vlgmr.msrb.gmra.mxu2 %vm80_vm0, %v828_v12 }
 0x142   :  { %664 = vmatmul.msk.f32.gmra.mxu2 %vm80_vm0, %v833_v14 }
 0x14a   :  { %665 = vmatmul.msk.f32.gmra.mxu2 %vm80_vm0, %v848_v17 }
 0x152   :  { %666 = vmatmul.msk.f32.gmra.mxu2 %vm80_vm0, %v857_v18 }
 0x1b3   :  { %v201_v5 = vpop.f32.mrf.mxu2 }
 0x1b4   :  { %v204_v6 = vmax.f32 %v201_v5, 0.0 }
 0x1b6   :  { %654 = vmatpush.msk.msra.mxu3 %vm218_vm3, %v204_v6 }
 0x1b7   :  { %655 = vmatmul.msk.f32.vlgmr.msra.gmra.mxu3 %vm205_vm4, %v945_v7 }
 0x1b8   :  { %414 = vmatpush.msrb.mxu3 %v373_v8 }
 0x1ba   :  { %415 = vmatpush.msrb.mxu3 %v371_v9 }
 0x1bc   :  { %416 = vmatpush.msrb.mxu3 %v369_v10 }
 0x1be   :  { %417 = vmatpush.msrb.mxu3 %v367_v11 }
 0x1bf   :  { %656 = vmatmul.msk.f32.gmra.mxu3 %vm205_vm4, %v953_v13 }
 0x1c0   :  { %418 = vmatpush.msrb.mxu3 %v365_v15 }
 0x1c7   :  { %657 = vmatmul.msk.f32.gmra.mxu3 %vm205_vm4, %v960_v16 }
 0x1cf   :  { %658 = vmatmul.msk.f32.gmra.mxu3 %vm205_vm4, %v967_v19 }
 0x1d7   :  { %667 = vmatmul.msk.f32.vlgmr.msrb.gmra.mxu3 %vm80_vm0, %v828_v12  ;;  %v979_v12 = vpop.f32.mrf.mxu2 }
 0x1df   :  { %668 = vmatmul.msk.f32.gmra.mxu3 %vm80_vm0, %v833_v14  ;;  %v394_v54 = vpop.f32.mrf.mxu2 }
 0x1e0   :  { %v982_v2 = vadd.f32 %v394_v54, %v867_v20 }
 0x1e2   :  { %v434_v11 = vmax.f32 %v982_v2, 0.0 }
 0x1e7   :  { %669 = vmatmul.msk.f32.gmra.mxu3 %vm80_vm0, %v848_v17  ;;  %v397_v8 = vpop.f32.mrf.mxu2 }
 0x1ef   :  { %670 = vmatmul.msk.f32.gmra.mxu3 %vm80_vm0, %v857_v18 }
 0x23a   :  { %v239_v21 = vpop.f32.mrf.mxu3 }
 0x242   :  { %v242_v24 = vpop.f32.mrf.mxu3 }
 0x243   :  { %v660_v26 = vmul.f32 -1.442695, %v242_v24 }
 0x245   :  { %694 = vpow2.f32 %v660_v26  ;;  %v995_v26 = vadd.f32 %v397_v8, %v888_v35 }
 0x24a   :  { %v245_v27 = vpop.f32.mrf.mxu3 }
 0x24b   :  { %v695_v30 = vpop.eup %694  ;;  %v661_v31 = vmul.f32 -1.442695, %v245_v27 }
 0x24c   :  { %v264_v32 = vadd.f32 1.0, %v695_v30 }
 0x24d   :  { %696 = vpow2.f32 %v661_v31  ;;  %v659_v31 = vmul.f32 -1.442695, %v239_v21 }
 0x24e   :  { %698 = vrcp.f32 %v264_v32  ;;  %v293_v18 = vand.u32 2147483648, %v264_v32  ;;  %v291_v52 = vand.u32 2147483647, %v264_v32  ;;  %vm287_vm6 = vweird.f32 %v264_v32 }
 0x250   :  { %v294_v57 = vor.u32 1.1754944e-38, %v293_v18  ;;  %vm292_vm8 = vcmp.eq.f32.partialorder %v291_v52, 8.507059e+37 }
 0x252   :  { %v248_v36 = vpop.f32.mrf.mxu3 }
 0x253   :  { %v697_v14 = vpop.eup %696  ;;  %v662_v21 = vmul.f32 -1.442695, %v248_v36  ;;  %v1026_v36 = vadd.f32 %v979_v12, %v900_v41 }
 0x254   :  { %v699_v39 = vpop.eup %698  ;;  %v265_v43 = vadd.f32 1.0, %v697_v14  ;;  %v436_v14 = vmax.f32 %v995_v26, 0.0 }
 0x255   :  { %v283_v17 = vmul.f32 %v699_v39, %v264_v32  ;;  %vm288_vm5 = vweird.f32 %v699_v39 }
 0x256   :  { %700 = vrcp.f32 %v265_v43  ;;  %vm289_vm7 = vmor %vm287_vm6, %vm288_vm5  ;;  %v308_v62 = vand.u32 2147483648, %v265_v43  ;;  %v306_v1 = vand.u32 2147483647, %v265_v43  ;;  %vm302_vm10 = vweird.f32 %v265_v43 }
 0x257   :  { %v284_v46 = vsub.f32 1.0, %v283_v17  ;;  %702 = vpow2.f32 %v659_v31 }
 0x258   :  { %v309_v6 = vor.u32 1.1754944e-38, %v308_v62  ;;  %vm307_vm12 = vcmp.eq.f32.partialorder %v306_v1, 8.507059e+37  ;;  %704 = vpow2.f32 %v662_v21 }
 0x259   :  { %v285_v49 = vmul.f32 %v699_v39, %v284_v46 }
 0x25a   :  { %v420_v53 = vpop.f32.mrf.mxu3 }
 0x25b   :  { %v286_v55 = vadd.f32 %v699_v39, %v285_v49  ;;  %v1014_v49 = vadd.f32 %v420_v53, %v900_v41 }
 0x25c   :  { %v701_v56 = vpop.eup %700 }
 0x25d   :  { %v290_v58 = vsel %vm289_vm7, %v699_v39, %v286_v55  ;;  %v298_v59 = vmul.f32 %v701_v56, %v265_v43  ;;  %vm303_vm9 = vweird.f32 %v701_v56  ;;  %v400_v39 = vpop.f32.mrf.mxu2  ;;  %v703_v54 = vpop.eup %702 }
 0x25e   :  { %v295_v60 = vsel %vm292_vm8, %v294_v57, %v290_v58  ;;  %vm304_vm11 = vmor %vm302_vm10, %vm303_vm9  ;;  %v1008_v46 = vadd.f32 %v400_v39, %v880_v29  ;;  %v263_v58 = vadd.f32 1.0, %v703_v54 }
 0x25f   :  { %334 = vperm.xlu0 %691, %v295_v60   ;;  %v299_v61 = vsub.f32 1.0, %v298_v59  ;;  %v705_v59 = vpop.eup %704  ;;  %v432_v60 = vmax.f32 %v1026_v36, 0.0 }
 0x260   :  { %v438_v55 = vmax.f32 %v1008_v46, 0.0  ;;  %706 = vrcp.f32 %v263_v58  ;;  %v266_v62 = vadd.f32 1.0, %v705_v59  ;;  %vm272_vm14 = vweird.f32 %v263_v58 }
 0x261   :  { %v300_v0 = vmul.f32 %v701_v56, %v299_v61 }
 0x262   :  { %v423_v3 = vpop.f32.mrf.mxu3  ;;  %708 = vrcp.f32 %v266_v62  ;;  %vm317_vm6 = vweird.f32 %v266_v62 }
 0x263   :  { %v985_v4 = vadd.f32 %v423_v3, %v867_v20  ;;  %v301_v5 = vadd.f32 %v701_v56, %v300_v0 }
 0x265   :  { %v435_v9 = vmax.f32 %v985_v4, 0.0  ;;  %v305_v10 = vsel %vm304_vm11, %v701_v56, %v301_v5 }
 0x266   :  { %v310_v15 = vsel %vm307_vm12, %v309_v6, %v305_v10  ;;  %v707_v0 = vpop.eup %706  ;;  %v278_v10 = vand.u32 2147483648, %v263_v58 }
 0x267   :  { %339 = vperm.xlu1 %692, %v310_v15   ;;  %v444_v24 = vsel %vm159_vm1, %v435_v9, 0.0  ;;  %v268_v1 = vmul.f32 %v707_v0, %v263_v58  ;;  %vm273_vm13 = vweird.f32 %v707_v0  ;;  %v276_v15 = vand.u32 2147483647, %v263_v58 }
 0x268   :  { %v445_v20 = vadd.f32 %v444_v24, %v434_v11  ;;  %v709_v41 = vpop.eup %708  ;;  %vm274_vm15 = vmor %vm272_vm14, %vm273_vm13 }
 0x269   :  { %v269_v3 = vsub.f32 1.0, %v268_v1  ;;  %v313_v5 = vmul.f32 %v709_v41, %v266_v62  ;;  %vm277_vm0 = vcmp.eq.f32.partialorder %v276_v15, 8.507059e+37  ;;  %vm318_vm5 = vweird.f32 %v709_v41 }
 0x26a   :  { %v426_v27 = vpop.f32.mrf.mxu3  ;;  %446 = vadd.xlane.f32.xlu2 %v445_v20  ;;  %vm319_vm7 = vmor %vm317_vm6, %vm318_vm5 }
 0x26b   :  { %v998_v30 = vadd.f32 %v426_v27, %v888_v35  ;;  %v270_v12 = vmul.f32 %v707_v0, %v269_v3  ;;  %v314_v8 = vsub.f32 1.0, %v313_v5  ;;  %v279_v27 = vor.u32 1.1754944e-38, %v278_v10 }
 0x26d   :  { %v437_v32 = vmax.f32 %v998_v30, 0.0  ;;  %v271_v6 = vadd.f32 %v707_v0, %v270_v12  ;;  %v315_v20 = vmul.f32 %v709_v41, %v314_v8 }
 0x26f   :  { %v448_v43 = vsel %vm159_vm1, %v437_v32, 0.0  ;;  %v275_v24 = vsel %vm274_vm15, %v707_v0, %v271_v6  ;;  %v316_v39 = vadd.f32 %v709_v41, %v315_v20 }
 0x270   :  { %v449_v17 = vadd.f32 %v448_v43, %v436_v14  ;;  %v280_v31 = vsel %vm277_vm0, %v279_v27, %v275_v24  ;;  %v323_v43 = vand.u32 2147483648, %v266_v62 }
 0x272   :  { %v429_v18 = vpop.f32.mrf.mxu3  ;;  %450 = vadd.xlane.f32.xlu2 %v449_v17  ;;  %v321_v17 = vand.u32 2147483647, %v266_v62  ;;  %v324_v21 = vor.u32 1.1754944e-38, %v323_v43 }
 0x273   :  { %v1011_v35 = vadd.f32 %v429_v18, %v880_v29  ;;  %v433_v29 = vmax.f32 %v1014_v49, 0.0  ;;  %v320_v18 = vsel %vm319_vm7, %v709_v41, %v316_v39 }
 0x274   :  { %vm322_vm8 = vcmp.eq.f32.partialorder %v321_v17, 8.507059e+37 }
 0x275   :  { %v439_v52 = vmax.f32 %v1011_v35, 0.0  ;;  %v440_v53 = vsel %vm159_vm1, %v433_v29, 0.0  ;;  %v325_v54 = vsel %vm322_vm8, %v324_v21, %v320_v18 }
 0x276   :  { %v441_v61 = vadd.f32 %v440_v53, %v432_v60 }
 0x277   :  { %v452_v56 = vsel %vm159_vm1, %v439_v52, 0.0 }
 0x278   :  { %v453_v57 = vadd.f32 %v452_v56, %v438_v55 }
 0x27a   :  { %454 = vadd.xlane.f32.xlu2 %v453_v57 }
 0x282   :  { %442 = vadd.xlane.f32.xlu2 %v441_v61 }
 0x29a   :  { %329 = vperm.xlu2 %693, %v280_v31  }
 0x2a2   :  { %344 = vperm.xlu2 %693, %v325_v54  }
 0x2d1   :  { %v335_v56 = vpop.permute.xlu0 %334 }
 0x2d2   :  { %v349_v57 = vmul.f32 %v335_v56, %v153_v28  ;;  %v350_v58 = vmul.f32 %v335_v56, %v154_v23 }
 0x2d4   :  { %357 = vst [vmem:[#allocation5 + $0x10] sm:$0xff] %v349_v57 }
 0x2d5   :  { %358 = vst.msk [vmem:[#allocation5 + $0x18] sm:$0xff] %vm159_vm1, %v350_v58 }
 0x2d9   :  { %v340_v53 = vpop.permute.xlu1 %339 }
 0x2da   :  { %v351_v59 = vmul.f32 %v340_v53, %v155_v47  ;;  %v352_v61 = vmul.f32 %v340_v53, %v156_v44 }
 0x2dc   :  { %359 = vst [vmem:[#allocation5 + $0x20] sm:$0xff] %v351_v59 }
 0x2dd   :  { %360 = vst.msk [vmem:[#allocation5 + $0x28] sm:$0xff] %vm159_vm1, %v352_v61  ;;  %v447_v62 = vpop.xlane.xlu2 %446 }
 0x2de   :  { %v457_v22 = vmul.f32 0.0069444445, %v447_v62 }
 0x2e5   :  { %v451_v0 = vpop.xlane.xlu2 %450 }
 0x2e6   :  { %v458_v1 = vmul.f32 0.0069444445, %v451_v0 }
 0x2ed   :  { %v455_v25 = vpop.xlane.xlu2 %454 }
 0x2ee   :  { %v459_v28 = vmul.f32 0.0069444445, %v455_v25 }
 0x2f0   :  { %472 = vmatpush.msra.mxu0 %v459_v28 }
 0x2f2   :  { %473 = vmatpush.msra.mxu0 %v458_v1 }
 0x2f4   :  { %474 = vmatpush.msra.mxu0 %v457_v22 }
 0x2f5   :  { %v443_v23 = vpop.xlane.xlu2 %442 }
 0x2f6   :  { %v456_v3 = vmul.f32 0.0069444445, %v443_v23 }
 0x2f8   :  { %475 = vmatpush.msra.mxu0 %v456_v3 }
 0x2f9   :  { %671 = vmatmul.msk.f32.vlgmr.msra.gmra.mxu0 %vm180_vm2, %v930_v63 }
 0x2fd   :  { %v330_v38 = vpop.permute.xlu2 %329 }
 0x2fe   :  { %v347_v42 = vmul.f32 %v330_v38, %v151_v51  ;;  %v348_v44 = vmul.f32 %v330_v38, %v152_v50 }
 0x300   :  { %355 = vst [vmem:[#allocation5] sm:$0xff] %v347_v42 }
 0x301   :  { %356 = vst.msk [vmem:[#allocation5 + $0x8] sm:$0xff] %vm159_vm1, %v348_v44 }
 0x305   :  { %v345_v47 = vpop.permute.xlu2 %344 }
 0x306   :  { %v353_v41 = vmul.f32 %v345_v47, %v157_v40  ;;  %v354_v12 = vmul.f32 %v345_v47, %v158_v34 }
 0x308   :  { %361 = vst [vmem:[#allocation5 + $0x30] sm:$0xff] %v353_v41 }
 0x309   :  { %362 = vst.msk [vmem:[#allocation5 + $0x38] sm:$0xff] %vm159_vm1, %v354_v12 }
 0x376   :  { %v477_v63 = vpop.f32.mrf.mxu0 }
 0x377   :  { %v480_v5 = vmax.f32 %v477_v63, 0.0 }
 0x379   :  { %672 = vmatpush.msk.msrb.mxu1 %vm218_vm3, %v480_v5 }
 0x37a   :  { %673 = vmatmul.msk.f32.vlgmr.msrb.gmra.mxu1 %vm205_vm4, %v945_v7 }
 0x382   :  { %674 = vmatmul.msk.f32.gmra.mxu1 %vm205_vm4, %v953_v13 }
 0x38a   :  { %675 = vmatmul.msk.f32.gmra.mxu1 %vm205_vm4, %v960_v16 }
 0x392   :  { %676 = vmatmul.msk.f32.gmra.mxu1 %vm205_vm4, %v967_v19 }
 0x3f7   :  { %v501_v33 = vpop.f32.mrf.mxu1 }
 0x3f8   :  { %v677_v34 = vmul.f32 -1.442695, %v501_v33 }
 0x3fa   :  { %710 = vpow2.f32 %v677_v34 }
 0x3ff   :  { %v504_v37 = vpop.f32.mrf.mxu1 }
 0x400   :  { %v711_v40 = vpop.eup %710  ;;  %v678_v45 = vmul.f32 -1.442695, %v504_v37 }
 0x401   :  { %v525_v48 = vadd.f32 1.0, %v711_v40 }
 0x402   :  { %712 = vpow2.f32 %v678_v45 }
 0x403   :  { %714 = vrcp.f32 %v525_v48  ;;  %v540_v10 = vand.u32 2147483648, %v525_v48  ;;  %v538_v15 = vand.u32 2147483647, %v525_v48  ;;  %vm534_vm3 = vweird.f32 %v525_v48 }
 0x405   :  { %v541_v17 = vor.u32 1.1754944e-38, %v540_v10  ;;  %vm539_vm9 = vcmp.eq.f32.partialorder %v538_v15, 8.507059e+37 }
 0x407   :  { %v507_v50 = vpop.f32.mrf.mxu1 }
 0x408   :  { %v713_v51 = vpop.eup %712  ;;  %v679_v7 = vmul.f32 -1.442695, %v507_v50 }
 0x409   :  { %v715_v6 = vpop.eup %714  ;;  %v526_v13 = vadd.f32 1.0, %v713_v51 }
 0x40a   :  { %716 = vpow2.f32 %v679_v7  ;;  %v530_v8 = vmul.f32 %v715_v6, %v525_v48  ;;  %vm535_vm2 = vweird.f32 %v715_v6 }
 0x40b   :  { %718 = vrcp.f32 %v526_v13  ;;  %vm536_vm4 = vmor %vm534_vm3, %vm535_vm2  ;;  %v555_v57 = vand.u32 2147483648, %v526_v13  ;;  %v553_v53 = vand.u32 2147483647, %v526_v13  ;;  %vm549_vm11 = vweird.f32 %v526_v13 }
 0x40c   :  { %v531_v16 = vsub.f32 1.0, %v530_v8 }
 0x40d   :  { %v556_v25 = vor.u32 1.1754944e-38, %v555_v57  ;;  %vm554_vm13 = vcmp.eq.f32.partialorder %v553_v53, 8.507059e+37 }
 0x40e   :  { %v532_v19 = vmul.f32 %v715_v6, %v531_v16 }
 0x40f   :  { %v510_v24 = vpop.f32.mrf.mxu1 }
 0x410   :  { %v717_v20 = vpop.eup %716  ;;  %v680_v27 = vmul.f32 -1.442695, %v510_v24  ;;  %v533_v31 = vadd.f32 %v715_v6, %v532_v19 }
 0x411   :  { %v719_v39 = vpop.eup %718  ;;  %v527_v43 = vadd.f32 1.0, %v717_v20 }
 0x412   :  { %720 = vpow2.f32 %v680_v27  ;;  %v537_v18 = vsel %vm536_vm4, %v715_v6, %v533_v31  ;;  %v545_v21 = vmul.f32 %v719_v39, %v526_v13  ;;  %vm550_vm10 = vweird.f32 %v719_v39 }
 0x413   :  { %722 = vrcp.f32 %v527_v43  ;;  %v542_v54 = vsel %vm539_vm9, %v541_v17, %v537_v18  ;;  %vm551_vm12 = vmor %vm549_vm11, %vm550_vm10  ;;  %v570_v3 = vand.u32 2147483648, %v527_v43  ;;  %v568_v42 = vand.u32 2147483647, %v527_v43 }
 0x414   :  { %591 = vperm.xlu0 %691, %v542_v54   ;;  %v546_v56 = vsub.f32 1.0, %v545_v21  ;;  %vm564_vm15 = vweird.f32 %v527_v43 }
 0x415   :  { %v571_v41 = vor.u32 1.1754944e-38, %v570_v3  ;;  %vm569_vm5 = vcmp.eq.f32.partialorder %v568_v42, 8.507059e+37 }
 0x416   :  { %v547_v58 = vmul.f32 %v719_v39, %v546_v56 }
 0x418   :  { %v721_v59 = vpop.eup %720  ;;  %v548_v61 = vadd.f32 %v719_v39, %v547_v58 }
 0x419   :  { %v723_v62 = vpop.eup %722  ;;  %v528_v0 = vadd.f32 1.0, %v721_v59 }
 0x41a   :  { %v552_v28 = vsel %vm551_vm12, %v719_v39, %v548_v61  ;;  %v560_v1 = vmul.f32 %v723_v62, %v527_v43  ;;  %vm565_vm14 = vweird.f32 %v723_v62 }
 0x41b   :  { %724 = vrcp.f32 %v528_v0  ;;  %v557_v22 = vsel %vm554_vm13, %v556_v25, %v552_v28  ;;  %vm566_vm0 = vmor %vm564_vm15, %vm565_vm14  ;;  %v585_v34 = vand.u32 2147483648, %v528_v0  ;;  %v583_v40 = vand.u32 2147483647, %v528_v0 }
 0x41c   :  { %596 = vperm.xlu2 %693, %v557_v22   ;;  %v561_v23 = vsub.f32 1.0, %v560_v1  ;;  %vm579_vm7 = vweird.f32 %v528_v0 }
 0x41d   :  { %v586_v48 = vor.u32 1.1754944e-38, %v585_v34  ;;  %vm584_vm2 = vcmp.eq.f32.partialorder %v583_v40, 8.507059e+37 }
 0x41e   :  { %v562_v38 = vmul.f32 %v723_v62, %v561_v23 }
 0x420   :  { %v563_v44 = vadd.f32 %v723_v62, %v562_v38 }
 0x421   :  { %v725_v47 = vpop.eup %724 }
 0x422   :  { %v567_v12 = vsel %vm566_vm0, %v723_v62, %v563_v44  ;;  %v575_v63 = vmul.f32 %v725_v47, %v528_v0  ;;  %vm580_vm6 = vweird.f32 %v725_v47 }
 0x423   :  { %v572_v5 = vsel %vm569_vm5, %v571_v41, %v567_v12  ;;  %vm581_vm8 = vmor %vm579_vm7, %vm580_vm6 }
 0x424   :  { %601 = vperm.xlu1 %692, %v572_v5   ;;  %v576_v33 = vsub.f32 1.0, %v575_v63 }
 0x426   :  { %v577_v37 = vmul.f32 %v725_v47, %v576_v33 }
 0x428   :  { %v578_v45 = vadd.f32 %v725_v47, %v577_v37 }
 0x42a   :  { %v582_v50 = vsel %vm581_vm8, %v725_v47, %v578_v45 }
 0x42b   :  { %v587_v51 = vsel %vm584_vm2, %v586_v48, %v582_v50 }
 0x42c   :  { %606 = vperm.xlu0 %691, %v587_v51  }
 0x476   :  { %v597_v7 = vpop.permute.xlu2 %596 }
 0x477   :  { %v611_v6 = vmul.f32 %v597_v7, %v434_v11  ;;  %v612_v13 = vmul.f32 %v597_v7, %v435_v9 }
 0x479   :  { %620 = vst [vmem:[#allocation5 + $0x50] sm:$0xff] %v611_v6 }
 0x47a   :  { %621 = vst.msk [vmem:[#allocation5 + $0x58] sm:$0xff] %vm159_vm1, %v612_v13 }
 0x486   :  { %v592_v8 = vpop.permute.xlu0 %591 }
 0x487   :  { %v609_v16 = vmul.f32 %v592_v8, %v432_v60  ;;  %v610_v10 = vmul.f32 %v592_v8, %v433_v29 }
 0x489   :  { %618 = vst [vmem:[#allocation5 + $0x40] sm:$0xff] %v609_v16 }
 0x48a   :  { %619 = vst.msk [vmem:[#allocation5 + $0x48] sm:$0xff] %vm159_vm1, %v610_v10 }
 0x496   :  { %v602_v19 = vpop.permute.xlu1 %601 }
 0x497   :  { %v613_v2 = vmul.f32 %v602_v19, %v436_v14  ;;  %v614_v4 = vmul.f32 %v602_v19, %v437_v32 }
 0x499   :  { %622 = vst [vmem:[#allocation5 + $0x60] sm:$0xff] %v613_v2 }
 0x49a   :  { %623 = vst.msk [vmem:[#allocation5 + $0x68] sm:$0xff] %vm159_vm1, %v614_v4 }
 0x49e   :  { %v607_v9 = vpop.permute.xlu0 %606 }
 0x49f   :  { %v615_v11 = vmul.f32 %v607_v9, %v438_v55  ;;  %v616_v26 = vmul.f32 %v607_v9, %v439_v52 }
 0x4a1   :  { %624 = vst [vmem:[#allocation5 + $0x70] sm:$0xff] %v615_v11 }
 0x4a2   :  { %625 = vst.msk [vmem:[#allocation5 + $0x78] sm:$0xff] %vm159_vm1, %v616_v26 }
 0x4a3   :  { %638 = dma.vmem_to_hbm [thread:$0]  %s631_s22, 2048, %s633_s26, [#allocation4], %s779_s23, %s779_s23, %s780_s24  }
 0x4a4   :  { %776 = dma.done.wait [#allocation4], 2048  }
 0x4a5   :  { %777 = vsyncadd [#allocation4], 4294965248 }
 0x4a6   :  { %643 = vsyncpa [#allocation3], 1 }
 0x4a7   :  { %644 = vsyncpa [#allocation4], 1 }

</bundles_post_ra>
